<compile_context>
chip_gen: v7x
topology: tpu7x:2x2x1
jax: 0.10.0
libtpu: 0.0.40
codegen_flags: <defaults>
</compile_context>

<pallas_src>
import jax
import jax.numpy as jnp
from jax.experimental import pallas as pl
from jax.experimental.pallas import tpu as pltpu


def _round_up(n, m):
    return ((n + m - 1) // m) * m


def _mlp_kernel(*refs):
    """Fused MLP forward on one batch tile.

    refs = (x_ref, w1, b1, w2, b2, ..., wN, bN, o_ref).
    x arrives in VMEM as f32 and is cast to bf16 here (VPU) right before the
    first dot; weights are bf16 (MXU fast path); bias-add / ReLU / matmul
    accumulation / final store are f32.
    """
    x_ref, *wb_refs, o_ref = refs
    n_layers = len(wb_refs) // 2

    h = x_ref[...].astype(jnp.bfloat16)
    for i in range(n_layers):
        w = wb_refs[2 * i][...]
        b = wb_refs[2 * i + 1][...]
        h = jnp.dot(h, w, preferred_element_type=jnp.float32) + b
        if i < n_layers - 1:
            # NOTE: on v5e (single vst slot, no bf16 VALU) dropping these
            # inter-layer bf16 casts can relieve pack/store pressure if a
            # bundle dump shows vst saturated; kept for v6e/v7x MXU speed.
            h = jnp.maximum(h, 0.0).astype(jnp.bfloat16)
    o_ref[...] = h.astype(o_ref.dtype)


def prepare_params(params):
    """One-time conversion of f32 (W (in,out), b (1,out)) params into
    kernel-ready operands: weights bf16, biases f32, and every hidden width
    zero-padded up to a multiple of 128 lanes.  Exactly correctness-
    preserving: padded columns get zero weight + zero bias, and the matching
    rows of the next layer's weight are zero."""
    ws = [w for w, _ in params]
    bs = [b for _, b in params]
    for i in range(len(ws) - 1):            # hidden layers only
        pad = (-ws[i].shape[1]) % 128
        if pad:
            ws[i] = jnp.pad(ws[i], ((0, 0), (0, pad)))
            bs[i] = jnp.pad(bs[i], ((0, 0), (0, pad)))
            ws[i + 1] = jnp.pad(ws[i + 1], ((0, pad), (0, 0)))
    flat = []
    for w, b in zip(ws, bs):
        flat += [w.astype(jnp.bfloat16), b.astype(jnp.float32)]
    return flat


def mlp_forward(x, flat_params, *, tm=2048):
    """x: (B, input_size) f32; flat_params: output of prepare_params."""
    B, in_size = x.shape
    out_size = flat_params[-1].shape[-1]     # last bias is (1, out)
    out_dtype = x.dtype

    weights = flat_params[0::2]
    weight_bytes = sum(int(p.size) * p.dtype.itemsize for p in flat_params)

    # ---- choose batch tiling from the chip's VMEM --------------------------
    try:
        vmem_cap = int(pltpu.get_tpu_info().vmem_capacity_bytes)
    except Exception:
        vmem_cap = 64 * 1024 * 1024          # v7x per-TC VMEM (smallest case)

    # VMEM bytes per batch row: double-buffered f32 x tile, in-kernel bf16
    # copy, double-buffered f32 out tile, f32+bf16 inter-layer activations.
    bytes_per_row = (2 * 4 * in_size + 2 * in_size + 2 * 4 * out_size
                     + 6 * sum(w.shape[1] for w in weights))
    act_budget = max(4 << 20, (vmem_cap * 2) // 5 - 2 * weight_bytes)
    tm_cap = max(16, (act_budget // bytes_per_row) // 16 * 16)

    B16 = _round_up(B, 16)                   # bf16-friendly sublane multiple
    tm_target = max(16, min(tm, tm_cap))
    n_tiles = pl.cdiv(B16, tm_target)
    if n_tiles == 1 and B16 >= 512:
        n_tiles = 2                          # keep both v7x TensorCores busy
    TM = _round_up(pl.cdiv(B16, n_tiles), 16)
    B_pad = TM * n_tiles                     # worst-case pad < 16 rows / tile

    if B_pad != B:
        x = jnp.pad(x, ((0, B_pad - B), (0, 0)))

    # ---- specs / compiler params -------------------------------------------
    x_spec = pl.BlockSpec((TM, in_size), lambda i: (i, 0))
    out_spec = pl.BlockSpec((TM, out_size), lambda i: (i, 0))

    def _const_spec(shape, single_buffer):
        if single_buffer and hasattr(pl, "Buffered"):
            # Constant index_map -> DMA'd once; single buffer (no dead copy).
            return pl.BlockSpec(shape, lambda i: (0, 0),
                                pipeline_mode=pl.Buffered(1))
        return pl.BlockSpec(shape, lambda i: (0, 0))

    est_vmem = 2 * weight_bytes + TM * bytes_per_row + (4 << 20)
    vmem_limit = int(min(vmem_cap * 9 // 10, max(est_vmem, 32 << 20)))

    cost = pl.CostEstimate(
        flops=2 * B_pad * sum(w.shape[0] * w.shape[1] for w in weights),
        transcendentals=0,
        bytes_accessed=int(B_pad * in_size * 4 + B_pad * out_size * 4
                           + weight_bytes),
    )

    def _call(single_buffer):
        in_specs = [x_spec] + [_const_spec(p.shape, single_buffer)
                               for p in flat_params]
        return pl.pallas_call(
            _mlp_kernel,
            out_shape=jax.ShapeDtypeStruct((B_pad, out_size), out_dtype),
            grid=(n_tiles,),
            in_specs=in_specs,
            out_specs=out_spec,
            compiler_params=pltpu.CompilerParams(
                dimension_semantics=("parallel",),
                vmem_limit_bytes=vmem_limit,
            ),
            cost_estimate=cost,
        )(x, *flat_params)

    try:
        out = _call(True)
    except Exception:
        # Fallback for JAX versions without BlockSpec pipeline_mode support.
        out = _call(False)

    return out[:B]


def init_params(key, input_size, output_size, hidden_sizes=(256, 128, 64)):
    """Deterministic init mimicking nn.Linear's uniform(-1/sqrt(in), 1/sqrt(in)).
    Weights are stored transposed vs PyTorch: (in_features, out_features)."""
    sizes = [input_size] + list(hidden_sizes) + [output_size]
    params = []
    for i in range(len(sizes) - 1):
        fan_in, fan_out = sizes[i], sizes[i + 1]
        key, kw, kb = jax.random.split(key, 3)
        bound = 1.0 / jnp.sqrt(fan_in)
        w = jax.random.uniform(kw, (fan_in, fan_out), jnp.float32, -bound, bound)
        b = jax.random.uniform(kb, (1, fan_out), jnp.float32, -bound, bound)
        params.append((w, b))
    return params


def mlp_reference(x, params):
    """Pure-JAX f32 reference of the PyTorch forward."""
    h = x
    for i, (w, b) in enumerate(params):
        h = h @ w + b
        if i < len(params) - 1:
            h = jnp.maximum(h, 0.0)
    return h


if __name__ == "__main__":
    key = jax.random.PRNGKey(0)
    k_x, k_p = jax.random.split(key)

    batch = 8
    input_size = 32
    output_size = 16

    x = jax.random.normal(k_x, (batch, input_size), dtype=jnp.float32)
    params = init_params(k_p, input_size, output_size)
    flat_params = prepare_params(params)       # one-time bf16 / padding prep

    out = mlp_forward(x, flat_params)
    out = jax.block_until_ready(out)

    ref = mlp_reference(x, params)
    assert out.shape == (batch, output_size), out.shape
    # bf16 matmul inputs with f32 accumulation -> loosened tolerance vs f32.
    assert jnp.allclose(out, ref, atol=5e-2, rtol=5e-2), "mismatch vs reference"

    print("KERNEL_OK")
</pallas_src>

<mosaic_0001>
module attributes {stable_mosaic.version = 11 : i64} {
  func.func @_mlp_kernel(%arg0: i32, %arg1: memref<16x32xf32, #tpu.memory_space<vmem>>, %arg2: memref<32x256xbf16, #tpu.memory_space<vmem>>, %arg3: memref<1x256xf32, #tpu.memory_space<vmem>>, %arg4: memref<256x128xbf16, #tpu.memory_space<vmem>>, %arg5: memref<1x128xf32, #tpu.memory_space<vmem>>, %arg6: memref<128x128xbf16, #tpu.memory_space<vmem>>, %arg7: memref<1x128xf32, #tpu.memory_space<vmem>>, %arg8: memref<128x16xbf16, #tpu.memory_space<vmem>>, %arg9: memref<1x16xf32, #tpu.memory_space<vmem>>, %arg10: memref<16x16xf32, #tpu.memory_space<vmem>>) attributes {dimension_semantics = [#tpu.dimension_semantics<parallel>], iteration_bounds = array<i64: 1>, scalar_prefetch = 0 : i64, scratch_operands = 0 : i64, tpu.core_type = #tpu.core_type<tc>, window_params = [{transform_indices = @transform_0, window_bounds = array<i64: 16, 32>}, {pipeline_mode = #tpu.pipeline_mode<synchronous>, transform_indices = @transform_1, window_bounds = array<i64: 32, 256>}, {pipeline_mode = #tpu.pipeline_mode<synchronous>, transform_indices = @transform_2, window_bounds = array<i64: 1, 256>}, {pipeline_mode = #tpu.pipeline_mode<synchronous>, transform_indices = @transform_3, window_bounds = array<i64: 256, 128>}, {pipeline_mode = #tpu.pipeline_mode<synchronous>, transform_indices = @transform_4, window_bounds = array<i64: 1, 128>}, {pipeline_mode = #tpu.pipeline_mode<synchronous>, transform_indices = @transform_5, window_bounds = array<i64: 128, 128>}, {pipeline_mode = #tpu.pipeline_mode<synchronous>, transform_indices = @transform_6, window_bounds = array<i64: 1, 128>}, {pipeline_mode = #tpu.pipeline_mode<synchronous>, transform_indices = @transform_7, window_bounds = array<i64: 128, 16>}, {pipeline_mode = #tpu.pipeline_mode<synchronous>, transform_indices = @transform_8, window_bounds = array<i64: 1, 16>}, {transform_indices = @transform_9, window_bounds = array<i64: 16, 16>}]} {
    %c0 = arith.constant 0 : index
    %c0_0 = arith.constant 0 : index
    %0 = vector.load %arg1[%c0, %c0_0] : memref<16x32xf32, #tpu.memory_space<vmem>>, vector<16x32xf32>
    %1 = arith.truncf %0 : vector<16x32xf32> to vector<16x32xbf16>
    %c0_1 = arith.constant 0 : index
    %c0_2 = arith.constant 0 : index
    %2 = vector.load %arg2[%c0_1, %c0_2] : memref<32x256xbf16, #tpu.memory_space<vmem>>, vector<32x256xbf16>
    %c0_3 = arith.constant 0 : index
    %c0_4 = arith.constant 0 : index
    %3 = vector.load %arg3[%c0_3, %c0_4] : memref<1x256xf32, #tpu.memory_space<vmem>>, vector<1x256xf32>
    %cst = arith.constant dense<0.000000e+00> : vector<16x256xf32>
    %4 = tpu.matmul %1, %2, %cst {dimension_numbers = #tpu.dot_dimension_numbers<[1], [0], [0], [1], [0, 0, 1, 1], [], []>} : vector<16x32xbf16>, vector<32x256xbf16>, vector<16x256xf32> -> vector<16x256xf32>
    %5 = vector.broadcast %3 : vector<1x256xf32> to vector<16x256xf32>
    %6 = arith.addf %4, %5 : vector<16x256xf32>
    %cst_5 = arith.constant 0.000000e+00 : f32
    %7 = vector.broadcast %cst_5 : f32 to vector<16x256xf32>
    %8 = arith.maximumf %6, %7 : vector<16x256xf32>
    %9 = arith.truncf %8 : vector<16x256xf32> to vector<16x256xbf16>
    %c0_6 = arith.constant 0 : index
    %c0_7 = arith.constant 0 : index
    %10 = vector.load %arg4[%c0_6, %c0_7] : memref<256x128xbf16, #tpu.memory_space<vmem>>, vector<256x128xbf16>
    %c0_8 = arith.constant 0 : index
    %c0_9 = arith.constant 0 : index
    %11 = vector.load %arg5[%c0_8, %c0_9] : memref<1x128xf32, #tpu.memory_space<vmem>>, vector<1x128xf32>
    %cst_10 = arith.constant dense<0.000000e+00> : vector<16x128xf32>
    %12 = tpu.matmul %9, %10, %cst_10 {dimension_numbers = #tpu.dot_dimension_numbers<[1], [0], [0], [1], [0, 0, 1, 1], [], []>} : vector<16x256xbf16>, vector<256x128xbf16>, vector<16x128xf32> -> vector<16x128xf32>
    %13 = vector.broadcast %11 : vector<1x128xf32> to vector<16x128xf32>
    %14 = arith.addf %12, %13 : vector<16x128xf32>
    %cst_11 = arith.constant 0.000000e+00 : f32
    %15 = vector.broadcast %cst_11 : f32 to vector<16x128xf32>
    %16 = arith.maximumf %14, %15 : vector<16x128xf32>
    %17 = arith.truncf %16 : vector<16x128xf32> to vector<16x128xbf16>
    %c0_12 = arith.constant 0 : index
    %c0_13 = arith.constant 0 : index
    %18 = vector.load %arg6[%c0_12, %c0_13] : memref<128x128xbf16, #tpu.memory_space<vmem>>, vector<128x128xbf16>
    %c0_14 = arith.constant 0 : index
    %c0_15 = arith.constant 0 : index
    %19 = vector.load %arg7[%c0_14, %c0_15] : memref<1x128xf32, #tpu.memory_space<vmem>>, vector<1x128xf32>
    %cst_16 = arith.constant dense<0.000000e+00> : vector<16x128xf32>
    %20 = tpu.matmul %17, %18, %cst_16 {dimension_numbers = #tpu.dot_dimension_numbers<[1], [0], [0], [1], [0, 0, 1, 1], [], []>} : vector<16x128xbf16>, vector<128x128xbf16>, vector<16x128xf32> -> vector<16x128xf32>
    %21 = vector.broadcast %19 : vector<1x128xf32> to vector<16x128xf32>
    %22 = arith.addf %20, %21 : vector<16x128xf32>
    %cst_17 = arith.constant 0.000000e+00 : f32
    %23 = vector.broadcast %cst_17 : f32 to vector<16x128xf32>
    %24 = arith.maximumf %22, %23 : vector<16x128xf32>
    %25 = arith.truncf %24 : vector<16x128xf32> to vector<16x128xbf16>
    %c0_18 = arith.constant 0 : index
    %c0_19 = arith.constant 0 : index
    %26 = vector.load %arg8[%c0_18, %c0_19] : memref<128x16xbf16, #tpu.memory_space<vmem>>, vector<128x16xbf16>
    %c0_20 = arith.constant 0 : index
    %c0_21 = arith.constant 0 : index
    %27 = vector.load %arg9[%c0_20, %c0_21] : memref<1x16xf32, #tpu.memory_space<vmem>>, vector<1x16xf32>
    %cst_22 = arith.constant dense<0.000000e+00> : vector<16x16xf32>
    %28 = tpu.matmul %25, %26, %cst_22 {dimension_numbers = #tpu.dot_dimension_numbers<[1], [0], [0], [1], [0, 0, 1, 1], [], []>} : vector<16x128xbf16>, vector<128x16xbf16>, vector<16x16xf32> -> vector<16x16xf32>
    %29 = vector.broadcast %27 : vector<1x16xf32> to vector<16x16xf32>
    %30 = arith.addf %28, %29 : vector<16x16xf32>
    %c0_23 = arith.constant 0 : index
    %c0_24 = arith.constant 0 : index
    %31 = vector.load %arg10[%c0_23, %c0_24] : memref<16x16xf32, #tpu.memory_space<vmem>>, vector<16x16xf32>
    tpu.vector_store %arg10[%c0_23, %c0_24], %30 {strides = array<i32>} : memref<16x16xf32, #tpu.memory_space<vmem>>, vector<16x16xf32>,
    return
  }
  func.func @transform_0(%arg0: i32) -> (i32, i32) {
    %c0_i32 = arith.constant 0 : i32
    %c0_i32_0 = arith.constant 0 : i32
    return %arg0, %c0_i32 : i32, i32
  }
  func.func @transform_1(%arg0: i32) -> (i32, i32) {
    %c0_i32 = arith.constant 0 : i32
    %c0_i32_0 = arith.constant 0 : i32
    %c0_i32_1 = arith.constant 0 : i32
    return %c0_i32, %c0_i32_0 : i32, i32
  }
  func.func @transform_2(%arg0: i32) -> (i32, i32) {
    %c0_i32 = arith.constant 0 : i32
    %c0_i32_0 = arith.constant 0 : i32
    %c0_i32_1 = arith.constant 0 : i32
    return %c0_i32, %c0_i32_0 : i32, i32
  }
  func.func @transform_3(%arg0: i32) -> (i32, i32) {
    %c0_i32 = arith.constant 0 : i32
    %c0_i32_0 = arith.constant 0 : i32
    %c0_i32_1 = arith.constant 0 : i32
    return %c0_i32, %c0_i32_0 : i32, i32
  }
  func.func @transform_4(%arg0: i32) -> (i32, i32) {
    %c0_i32 = arith.constant 0 : i32
    %c0_i32_0 = arith.constant 0 : i32
    %c0_i32_1 = arith.constant 0 : i32
    return %c0_i32, %c0_i32_0 : i32, i32
  }
  func.func @transform_5(%arg0: i32) -> (i32, i32) {
    %c0_i32 = arith.constant 0 : i32
    %c0_i32_0 = arith.constant 0 : i32
    %c0_i32_1 = arith.constant 0 : i32
    return %c0_i32, %c0_i32_0 : i32, i32
  }
  func.func @transform_6(%arg0: i32) -> (i32, i32) {
    %c0_i32 = arith.constant 0 : i32
    %c0_i32_0 = arith.constant 0 : i32
    %c0_i32_1 = arith.constant 0 : i32
    return %c0_i32, %c0_i32_0 : i32, i32
  }
  func.func @transform_7(%arg0: i32) -> (i32, i32) {
    %c0_i32 = arith.constant 0 : i32
    %c0_i32_0 = arith.constant 0 : i32
    %c0_i32_1 = arith.constant 0 : i32
    return %c0_i32, %c0_i32_0 : i32, i32
  }
  func.func @transform_8(%arg0: i32) -> (i32, i32) {
    %c0_i32 = arith.constant 0 : i32
    %c0_i32_0 = arith.constant 0 : i32
    %c0_i32_1 = arith.constant 0 : i32
    return %c0_i32, %c0_i32_0 : i32, i32
  }
  func.func @transform_9(%arg0: i32) -> (i32, i32) {
    %c0_i32 = arith.constant 0 : i32
    %c0_i32_0 = arith.constant 0 : i32
    return %arg0, %c0_i32 : i32, i32
  }
}

module attributes {stable_mosaic.version = 11 : i64} {
  func.func @_mlp_kernel(%arg0: i32, %arg1: memref<16x32xf32, #tpu.memory_space<vmem>>, %arg2: memref<32x256xbf16, #tpu.memory_space<vmem>>, %arg3: memref<1x256xf32, #tpu.memory_space<vmem>>, %arg4: memref<256x128xbf16, #tpu.memory_space<vmem>>, %arg5: memref<1x128xf32, #tpu.memory_space<vmem>>, %arg6: memref<128x128xbf16, #tpu.memory_space<vmem>>, %arg7: memref<1x128xf32, #tpu.memory_space<vmem>>, %arg8: memref<128x16xbf16, #tpu.memory_space<vmem>>, %arg9: memref<1x16xf32, #tpu.memory_space<vmem>>, %arg10: memref<16x16xf32, #tpu.memory_space<vmem>>) attributes {dimension_semantics = [#tpu.dimension_semantics<parallel>], iteration_bounds = array<i64: 1>, scalar_prefetch = 0 : i64, scratch_operands = 0 : i64, tpu.core_type = #tpu.core_type<tc>, window_params = [{transform_indices = @transform_0, window_bounds = array<i64: 16, 32>}, {pipeline_mode = #tpu.pipeline_mode<synchronous>, transform_indices = @transform_1, window_bounds = array<i64: 32, 256>}, {pipeline_mode = #tpu.pipeline_mode<synchronous>, transform_indices = @transform_2, window_bounds = array<i64: 1, 256>}, {pipeline_mode = #tpu.pipeline_mode<synchronous>, transform_indices = @transform_3, window_bounds = array<i64: 256, 128>}, {pipeline_mode = #tpu.pipeline_mode<synchronous>, transform_indices = @transform_4, window_bounds = array<i64: 1, 128>}, {pipeline_mode = #tpu.pipeline_mode<synchronous>, transform_indices = @transform_5, window_bounds = array<i64: 128, 128>}, {pipeline_mode = #tpu.pipeline_mode<synchronous>, transform_indices = @transform_6, window_bounds = array<i64: 1, 128>}, {pipeline_mode = #tpu.pipeline_mode<synchronous>, transform_indices = @transform_7, window_bounds = array<i64: 128, 16>}, {pipeline_mode = #tpu.pipeline_mode<synchronous>, transform_indices = @transform_8, window_bounds = array<i64: 1, 16>}, {transform_indices = @transform_9, window_bounds = array<i64: 16, 16>}]} {
    %c0 = arith.constant 0 : index
    %c0_0 = arith.constant 0 : index
    %0 = vector.load %arg1[%c0, %c0_0] : memref<16x32xf32, #tpu.memory_space<vmem>>, vector<16x32xf32>
    %1 = arith.truncf %0 : vector<16x32xf32> to vector<16x32xbf16>
    %c0_1 = arith.constant 0 : index
    %c0_2 = arith.constant 0 : index
    %2 = vector.load %arg2[%c0_1, %c0_2] : memref<32x256xbf16, #tpu.memory_space<vmem>>, vector<32x256xbf16>
    %c0_3 = arith.constant 0 : index
    %c0_4 = arith.constant 0 : index
    %3 = vector.load %arg3[%c0_3, %c0_4] : memref<1x256xf32, #tpu.memory_space<vmem>>, vector<1x256xf32>
    %cst = arith.constant dense<0.000000e+00> : vector<16x256xf32>
    %4 = tpu.matmul %1, %2, %cst {dimension_numbers = #tpu.dot_dimension_numbers<[1], [0], [0], [1], [0, 0, 1, 1], [], []>} : vector<16x32xbf16>, vector<32x256xbf16>, vector<16x256xf32> -> vector<16x256xf32>
    %5 = vector.broadcast %3 : vector<1x256xf32> to vector<16x256xf32>
    %6 = arith.addf %4, %5 : vector<16x256xf32>
    %cst_5 = arith.constant 0.000000e+00 : f32
    %7 = vector.broadcast %cst_5 : f32 to vector<16x256xf32>
    %8 = arith.maximumf %6, %7 : vector<16x256xf32>
    %9 = arith.truncf %8 : vector<16x256xf32> to vector<16x256xbf16>
    %c0_6 = arith.constant 0 : index
    %c0_7 = arith.constant 0 : index
    %10 = vector.load %arg4[%c0_6, %c0_7] : memref<256x128xbf16, #tpu.memory_space<vmem>>, vector<256x128xbf16>
    %c0_8 = arith.constant 0 : index
    %c0_9 = arith.constant 0 : index
    %11 = vector.load %arg5[%c0_8, %c0_9] : memref<1x128xf32, #tpu.memory_space<vmem>>, vector<1x128xf32>
    %cst_10 = arith.constant dense<0.000000e+00> : vector<16x128xf32>
    %12 = tpu.matmul %9, %10, %cst_10 {dimension_numbers = #tpu.dot_dimension_numbers<[1], [0], [0], [1], [0, 0, 1, 1], [], []>} : vector<16x256xbf16>, vector<256x128xbf16>, vector<16x128xf32> -> vector<16x128xf32>
    %13 = vector.broadcast %11 : vector<1x128xf32> to vector<16x128xf32>
    %14 = arith.addf %12, %13 : vector<16x128xf32>
    %cst_11 = arith.constant 0.000000e+00 : f32
    %15 = vector.broadcast %cst_11 : f32 to vector<16x128xf32>
    %16 = arith.maximumf %14, %15 : vector<16x128xf32>
    %17 = arith.truncf %16 : vector<16x128xf32> to vector<16x128xbf16>
    %c0_12 = arith.constant 0 : index
    %c0_13 = arith.constant 0 : index
    %18 = vector.load %arg6[%c0_12, %c0_13] : memref<128x128xbf16, #tpu.memory_space<vmem>>, vector<128x128xbf16>
    %c0_14 = arith.constant 0 : index
    %c0_15 = arith.constant 0 : index
    %19 = vector.load %arg7[%c0_14, %c0_15] : memref<1x128xf32, #tpu.memory_space<vmem>>, vector<1x128xf32>
    %cst_16 = arith.constant dense<0.000000e+00> : vector<16x128xf32>
    %20 = tpu.matmul %17, %18, %cst_16 {dimension_numbers = #tpu.dot_dimension_numbers<[1], [0], [0], [1], [0, 0, 1, 1], [], []>} : vector<16x128xbf16>, vector<128x128xbf16>, vector<16x128xf32> -> vector<16x128xf32>
    %21 = vector.broadcast %19 : vector<1x128xf32> to vector<16x128xf32>
    %22 = arith.addf %20, %21 : vector<16x128xf32>
    %cst_17 = arith.constant 0.000000e+00 : f32
    %23 = vector.broadcast %cst_17 : f32 to vector<16x128xf32>
    %24 = arith.maximumf %22, %23 : vector<16x128xf32>
    %25 = arith.truncf %24 : vector<16x128xf32> to vector<16x128xbf16>
    %c0_18 = arith.constant 0 : index
    %c0_19 = arith.constant 0 : index
    %26 = vector.load %arg8[%c0_18, %c0_19] : memref<128x16xbf16, #tpu.memory_space<vmem>>, vector<128x16xbf16>
    %c0_20 = arith.constant 0 : index
    %c0_21 = arith.constant 0 : index
    %27 = vector.load %arg9[%c0_20, %c0_21] : memref<1x16xf32, #tpu.memory_space<vmem>>, vector<1x16xf32>
    %cst_22 = arith.constant dense<0.000000e+00> : vector<16x16xf32>
    %28 = tpu.matmul %25, %26, %cst_22 {dimension_numbers = #tpu.dot_dimension_numbers<[1], [0], [0], [1], [0, 0, 1, 1], [], []>} : vector<16x128xbf16>, vector<128x16xbf16>, vector<16x16xf32> -> vector<16x16xf32>
    %29 = vector.broadcast %27 : vector<1x16xf32> to vector<16x16xf32>
    %30 = arith.addf %28, %29 : vector<16x16xf32>
    %c0_23 = arith.constant 0 : index
    %c0_24 = arith.constant 0 : index
    %31 = vector.load %arg10[%c0_23, %c0_24] : memref<16x16xf32, #tpu.memory_space<vmem>>, vector<16x16xf32>
    tpu.vector_store %arg10[%c0_23, %c0_24], %30 {strides = array<i32>} : memref<16x16xf32, #tpu.memory_space<vmem>>, vector<16x16xf32>,
    return
  }
  func.func @transform_0(%arg0: i32) -> (i32, i32) {
    %c0_i32 = arith.constant 0 : i32
    %c0_i32_0 = arith.constant 0 : i32
    return %arg0, %c0_i32 : i32, i32
  }
  func.func @transform_1(%arg0: i32) -> (i32, i32) {
    %c0_i32 = arith.constant 0 : i32
    %c0_i32_0 = arith.constant 0 : i32
    %c0_i32_1 = arith.constant 0 : i32
    return %c0_i32, %c0_i32_0 : i32, i32
  }
  func.func @transform_2(%arg0: i32) -> (i32, i32) {
    %c0_i32 = arith.constant 0 : i32
    %c0_i32_0 = arith.constant 0 : i32
    %c0_i32_1 = arith.constant 0 : i32
    return %c0_i32, %c0_i32_0 : i32, i32
  }
  func.func @transform_3(%arg0: i32) -> (i32, i32) {
    %c0_i32 = arith.constant 0 : i32
    %c0_i32_0 = arith.constant 0 : i32
    %c0_i32_1 = arith.constant 0 : i32
    return %c0_i32, %c0_i32_0 : i32, i32
  }
  func.func @transform_4(%arg0: i32) -> (i32, i32) {
    %c0_i32 = arith.constant 0 : i32
    %c0_i32_0 = arith.constant 0 : i32
    %c0_i32_1 = arith.constant 0 : i32
    return %c0_i32, %c0_i32_0 : i32, i32
  }
  func.func @transform_5(%arg0: i32) -> (i32, i32) {
    %c0_i32 = arith.constant 0 : i32
    %c0_i32_0 = arith.constant 0 : i32
    %c0_i32_1 = arith.constant 0 : i32
    return %c0_i32, %c0_i32_0 : i32, i32
  }
  func.func @transform_6(%arg0: i32) -> (i32, i32) {
    %c0_i32 = arith.constant 0 : i32
    %c0_i32_0 = arith.constant 0 : i32
    %c0_i32_1 = arith.constant 0 : i32
    return %c0_i32, %c0_i32_0 : i32, i32
  }
  func.func @transform_7(%arg0: i32) -> (i32, i32) {
    %c0_i32 = arith.constant 0 : i32
    %c0_i32_0 = arith.constant 0 : i32
    %c0_i32_1 = arith.constant 0 : i32
    return %c0_i32, %c0_i32_0 : i32, i32
  }
  func.func @transform_8(%arg0: i32) -> (i32, i32) {
    %c0_i32 = arith.constant 0 : i32
    %c0_i32_0 = arith.constant 0 : i32
    %c0_i32_1 = arith.constant 0 : i32
    return %c0_i32, %c0_i32_0 : i32, i32
  }
  func.func @transform_9(%arg0: i32) -> (i32, i32) {
    %c0_i32 = arith.constant 0 : i32
    %c0_i32_0 = arith.constant 0 : i32
    return %arg0, %c0_i32 : i32, i32
  }
}

</mosaic_0001>

<bundles_post_ra>
// kernel: tpu_custom_call.1
= control target key start
LH: loop header
LB: loop body
LE: loop exit
PB: predicated region body
PF: predicated region fallthrough
CT: control target
= control target key end

     0   :  { %14 = vsyncpa [#allocation3], 0  ;;  %s1007_s0 = inlined_call_operand.vmem [shape: f32[16,32], index: 0, kind: input, shape index: {}]   ;;  %s1008_s1 = inlined_call_operand.hbm [shape: bf16[32,256], index: 1, kind: input, shape index: {}]   ;;  %s1009_s2 = inlined_call_operand.vmem [shape: f32[1,256], index: 2, kind: input, shape index: {}]   ;;  %s1010_s3 = inlined_call_operand.hbm [shape: bf16[256,128], index: 3, kind: input, shape index: {}]   ;;  %s1011_s4 = inlined_call_operand.vmem [shape: f32[1,128], index: 4, kind: input, shape index: {}]   ;;  %s1012_s5 = inlined_call_operand.vmem [shape: bf16[128,128], index: 5, kind: input, shape index: {}]   ;;  %s1013_s6 = inlined_call_operand.vmem [shape: f32[1,128], index: 6, kind: input, shape index: {}]   ;;  %s1014_s7 = inlined_call_operand.vmem [shape: bf16[128,16], index: 7, kind: input, shape index: {}]   ;;  %s1015_s8 = inlined_call_operand.vmem [shape: f32[1,16], index: 8, kind: input, shape index: {}]   ;;  %s1016_s9 = inlined_call_operand.hbm [shape: f32[16,16], index: 9, kind: output, shape index: {}]  }
   0x1   :  { %15 = vsyncpa [#allocation6], 0 }
   0x2   :  { %16 = vsyncpa [#allocation4], 0  ;;  %s821_s30 = smov [#allocation2]   ;;  %s749_s13 = scalar_lea.hbm %s1008_s1, 512 }
   0x3   :  { %s24_s10 = sshll.u32 %s821_s30, 4  ;;  %p750_p0 = scmp.ne.s32.totalorder %s1008_s1, %s749_s13  ;;  %s25_s10 = int_to_ptr.vmem [resolvable:$true] %s24_s10 }
   0x4   :  { %p753_p1 = scmp.lt.u32.totalorder %s749_s13, %s1008_s1 }
   0x6   :  { %p755_p2 = pnand %p753_p1, %p750_p0 }
   0x8   :  { %758 = shalt.err (!%p755_p2)
}
   0x9   :  { %s759_s18 = scalar_lea.vmem %s25_s10, 512  ;;  %p764_p4 = scmp.lt.s32.totalorder %s25_s10, %s25_s10 }
   0xa   :  { %p760_p3 = scmp.ne.s32.totalorder %s25_s10, %s759_s18  ;;  %p765_p5 = scmp.lt.s32.totalorder %s759_s18, %s759_s18 }
   0xc   :  { %p766_p6 = por %p765_p5, %p764_p4 }
   0xe   :  { %p767_p7 = pnand %p766_p6, %p760_p3 }
  0x10   :  { %770 = shalt.err (!%p767_p7)
}
  0x11   :  { %s822_s19 = smov 128   ;;  %s823_s20 = smov 8  }
  0x12   :  { %30 = dma.hbm_to_vmem [thread:$0]  %s1008_s1, 512, %s25_s10, [#allocation3], %s822_s19, %s822_s19, %s823_s20  }
  0x13   :  { %s824_s23 = smov [#allocation5]   ;;  %s771_s27 = scalar_lea.hbm %s1010_s3, 2048 }
  0x14   :  { %s38_s24 = sshll.u32 %s824_s23, 4  ;;  %p772_p8 = scmp.ne.s32.totalorder %s1010_s3, %s771_s27  ;;  %s39_s24 = int_to_ptr.vmem [resolvable:$true] %s38_s24 }
  0x15   :  { %p775_p9 = scmp.lt.u32.totalorder %s771_s27, %s1010_s3 }
  0x17   :  { %p777_p10 = pnand %p775_p9, %p772_p8 }
  0x19   :  { %780 = shalt.err (!%p777_p10)
}
  0x1a   :  { %s781_s12 = scalar_lea.vmem %s39_s24, 2048  ;;  %p786_p12 = scmp.lt.s32.totalorder %s39_s24, %s39_s24 }
  0x1b   :  { %p782_p11 = scmp.ne.s32.totalorder %s39_s24, %s781_s12  ;;  %p787_p13 = scmp.lt.s32.totalorder %s781_s12, %s781_s12 }
  0x1d   :  { %p788_p0 = por %p787_p13, %p786_p12 }
  0x1f   :  { %p789_p1 = pnand %p788_p0, %p782_p11 }
  0x21   :  { %792 = shalt.err (!%p789_p1)
}
  0x22   :  { %s825_s1 = smov 64   ;;  %s826_s10 = smov 4  }
  0x23   :  { %44 = dma.hbm_to_vmem [thread:$0]  %s1010_s3, 2048, %s39_s24, [#allocation6], %s825_s1, %s825_s1, %s826_s10  }
  0x24   :  { %815 = dma.done.wait [#allocation3], 512  }
  0x25   :  { %816 = vsyncadd [#allocation3], 4294966784 }
  0x26   :  { %817 = dma.done.wait [#allocation6], 2048  }
  0x27   :  { %818 = vsyncadd [#allocation6], 4294965248  ;;  %v827_v0 = vmov 0   ;;  %v711_v1 = vld [vmem:[#allocation2 + $0x4] ss:$8 sps:$4 sm:$0xff]   ;;  %vm101_vm0 = vcmask 261120   ;;  %v71_v30 = vlaneseq }
  0x28   :  { %137 = vmatprep.mubr.bf16.mxu0 %v827_v0  ;;  %v713_v2 = vld [vmem:[#allocation2] ss:$8 sps:$4 sm:$0xff]   ;;  %105 = vmatprep.subr.bf16.mxu0 %v711_v1  ;;  %v714_v3 = vld [vmem:[#allocation2 + $0x14] ss:$8 sps:$4 sm:$0xff]   ;;  %v716_v4 = vld [vmem:[#allocation2 + $0x10] ss:$8 sps:$4 sm:$0xff]  }
  0x29   :  { %v62_v5 = vld [vmem:[%s1007_s0] sm:$0xff]  ;;  %106 = vmatpush1.bf16.msra.mxu0 %v713_v2  ;;  %v63_v6 = vld [vmem:[%s1007_s0 + $0x8] sm:$0xff]  ;;  %v721_v12 = vld [vmem:[#allocation5 + $0x50] sm:$0xff]   ;;  %v828_v25 = vmov 0.0   ;;  %v72_v31 = vshrl.u32 %v71_v30, 7  ;;  %vm829_vm1 = vmmov 0  }
  0x2a   :  { %107 = vmatprep.subr.bf16.mxu0 %v714_v3  ;;  %v717_v7 = vld [vmem:[#allocation5 + $0x40] sm:$0xff]   ;;  %v64_v9 = vpack.c.bf16 %v63_v6, %v62_v5  ;;  %v719_v10 = vld [vmem:[#allocation5 + $0x48] sm:$0xff]   ;;  %v722_v13 = vld [vmem:[#allocation5 + $0x10] sm:$0xff]   ;;  %vm560_vm2 = vcmask 130048  }
  0x2b   :  { %v718_v8 = vld [vmem:[#allocation5] sm:$0xff]   ;;  %621 = vmatprep.subr.bf16.mxu1 %v717_v7  ;;  %v720_v11 = vld [vmem:[#allocation5 + $0x8] sm:$0xff]   ;;  %v723_v14 = vld [vmem:[#allocation5 + $0x58] sm:$0xff]   ;;  %v73_v32 = vsub.s32 0, %v72_v31  ;;  %v77_v34 = vsub.s32 1, %v72_v31 }
  0x2c   :  { %622 = vmatpush3.bf16.msra.mxu1 %v718_v8  ;;  %v724_v15 = vld [vmem:[#allocation5 + $0x18] sm:$0xff]   ;;  %v725_v16 = vld [vmem:[#allocation5 + $0x60] sm:$0xff]   ;;  %v727_v18 = vld [vmem:[#allocation5 + $0x68] sm:$0xff]  }
  0x2d   :  { %108 = vmatpush1.bf16.msra.mxu0 %v716_v4  ;;  %623 = vmatprep.subr.bf16.mxu1 %v719_v10  ;;  %v726_v17 = vld [vmem:[#allocation5 + $0x20] sm:$0xff]   ;;  %v728_v19 = vld [vmem:[#allocation5 + $0x28] sm:$0xff]   ;;  %v729_v20 = vld [vmem:[#allocation5 + $0x70] sm:$0xff]  }
  0x2e   :  { %v730_v21 = vld [vmem:[#allocation5 + $0x30] sm:$0xff]   ;;  %v731_v22 = vld [vmem:[#allocation5 + $0x78] sm:$0xff]   ;;  %v733_v24 = vld [vmem:[%s1012_s5] sm:$0xff]   ;;  %661 = vmatprep.subr.bf16.mxu0 %v828_v25 }
  0x2f   :  { %v732_v23 = vld [vmem:[#allocation5 + $0x38] sm:$0xff]   ;;  %v734_v26 = vld [vmem:[%s1012_s5 + $0x8] sm:$0xff]   ;;  %v735_v27 = vld [vmem:[%s1012_s5 + $0x10] sm:$0xff]  }
  0x30   :  { %585 = vmatmul.mubr.msk.bf16.vlgmr.msra.gmra.mrb[0].mxu0 %vm101_vm0, %v64_v9  ;;  %624 = vmatpush3.bf16.msra.mxu1 %v720_v11  ;;  %v736_v28 = vld [vmem:[%s1012_s5 + $0x18] sm:$0xff]   ;;  %v737_v29 = vld [vmem:[%s1012_s5 + $0x20] sm:$0xff]   ;;  %v738_v51 = vld [vmem:[%s1012_s5 + $0x28] sm:$0xff]  }
  0x31   :  { %625 = vmatprep.subr.bf16.mxu1 %v721_v12  ;;  %662 = vmatpush3.bf16.msra.mxu0 %v733_v24  ;;  %v69_v33 = vld [vmem:[%s1009_s2] sm:$0x3]  ;;  %v739_v52 = vld [vmem:[%s1012_s5 + $0x30] sm:$0xff]   ;;  %v740_v53 = vld [vmem:[%s1012_s5 + $0x38] sm:$0xff]  }
  0x32   :  { %663 = vmatprep.subr.bf16.mxu0 %v828_v25  ;;  %v74_v35 = vrot.slane %v69_v33, %v73_v32  ;;  %v78_v36 = vrot.slane %v69_v33, %v77_v34  ;;  %677 = vmatprep.mubr.msk.bf16.mxu0 %vm829_vm1, %v828_v25  ;;  %v741_v54 = vld [vmem:[%s1014_s7] sm:$0xff]   ;;  %v742_v55 = vld [vmem:[%s1014_s7 + $0x8] sm:$0xff]   ;;  %v743_v56 = vld [vmem:[%s1014_s7 + $0x10] sm:$0xff]  }
  0x33   :  { %v744_v57 = vld [vmem:[%s1014_s7 + $0x18] sm:$0xff]   ;;  %v745_v58 = vld [vmem:[%s1014_s7 + $0x20] sm:$0xff]   ;;  %v746_v59 = vld [vmem:[%s1014_s7 + $0x28] sm:$0xff]  }
  0x34   :  { %626 = vmatpush3.bf16.msra.mxu1 %v722_v13  ;;  %v586_v61 = vld [vmem:[%s1011_s4] ss:$0 sm:$0xff]  ;;  %v747_v8 = vld [vmem:[%s1014_s7 + $0x30] sm:$0xff]   ;;  %v748_v9 = vld [vmem:[%s1014_s7 + $0x38] sm:$0xff]   ;;  %s830_s7 = smov [#allocation7]  }
  0x35   :  { %627 = vmatprep.subr.bf16.mxu1 %v723_v14  ;;  %664 = vmatpush3.bf16.msra.mxu0 %v734_v26  ;;  %v603_v10 = vld [vmem:[%s1013_s6] ss:$0 sm:$0xff]  ;;  %s568_s1 = sshll.u32 %s830_s7, 4  ;;  %s569_s1 = int_to_ptr.vmem [resolvable:$true] %s568_s1 }
  0x36   :  { %665 = vmatprep.subr.bf16.mxu0 %v828_v25  ;;  %s793_s6 = scalar_lea.vmem %s569_s1, 256  ;;  %p798_p3 = scmp.lt.s32.totalorder %s569_s1, %s569_s1 }
  0x37   :  { %p794_p2 = scmp.ne.s32.totalorder %s569_s1, %s793_s6  ;;  %p799_p4 = scmp.lt.s32.totalorder %s793_s6, %s793_s6 }
  0x38   :  { %628 = vmatpush3.bf16.msra.mxu1 %v724_v15 }
  0x39   :  { %629 = vmatprep.subr.bf16.mxu1 %v725_v16  ;;  %666 = vmatpush3.bf16.msra.mxu0 %v735_v27  ;;  %p800_p5 = por %p799_p4, %p798_p3 }
  0x3a   :  { %667 = vmatprep.subr.bf16.mxu0 %v828_v25 }
  0x3b   :  { %p801_p6 = pnand %p800_p5, %p794_p2 }
  0x3c   :  { %630 = vmatpush3.bf16.msra.mxu1 %v726_v17 }
  0x3d   :  { %631 = vmatprep.subr.bf16.mxu1 %v727_v18  ;;  %668 = vmatpush3.bf16.msra.mxu0 %v736_v28 }
  0x3e   :  { %669 = vmatprep.subr.bf16.mxu0 %v828_v25 }
  0x40   :  { %632 = vmatpush3.bf16.msra.mxu1 %v728_v19 }
  0x41   :  { %633 = vmatprep.subr.bf16.mxu1 %v729_v20  ;;  %670 = vmatpush3.bf16.msra.mxu0 %v737_v29  ;;  %v612_v20 = vld [vmem:[%s1015_s8] ss:$0 sm:$0xff] }
  0x42   :  { %671 = vmatprep.subr.bf16.mxu0 %v828_v25 }
  0x44   :  { %634 = vmatpush3.bf16.msra.mxu1 %v730_v21 }
  0x45   :  { %635 = vmatprep.subr.bf16.mxu1 %v731_v22  ;;  %672 = vmatpush3.bf16.msra.mxu0 %v738_v51 }
  0x46   :  { %673 = vmatprep.subr.bf16.mxu0 %v828_v25 }
  0x48   :  { %636 = vmatpush3.bf16.msra.mxu1 %v732_v23 }
  0x49   :  { %681 = vmatprep.subr.bf16.mxu1 %v828_v25  ;;  %674 = vmatpush3.bf16.msra.mxu0 %v739_v52 }
  0x4a   :  { %675 = vmatprep.subr.bf16.mxu0 %v828_v25 }
  0x4d   :  { %676 = vmatpush3.bf16.msra.mxu0 %v740_v53 }
 0x103   :  { %v139_v37 = vpop.f32.mrb[0].mxu0 }
 0x104   :  { %v140_v38 = vadd.f32 %v139_v37, %v74_v35  ;;  %v141_v39 = vpop.f32.mrb[1].mxu0 }
 0x105   :  { %v142_v40 = vadd.f32 %v141_v39, %v78_v36  ;;  %v143_v41 = vpop.f32.mrb[2].mxu0 }
 0x106   :  { %v144_v42 = vadd.f32 %v143_v41, %v74_v35  ;;  %v145_v43 = vpop.f32.mrb[3].mxu0  ;;  %v148_v45 = vmax.f32 %v140_v38, 0.0 }
 0x107   :  { %v146_v44 = vadd.f32 %v145_v43, %v78_v36  ;;  %v149_v47 = vmax.f32 %v142_v40, 0.0 }
 0x108   :  { %v150_v46 = vmax.f32 %v144_v42, 0.0 }
 0x109   :  { %v151_v48 = vmax.f32 %v146_v44, 0.0 }
 0x10a   :  { %v152_v49 = vpack.c.bf16 %v150_v46, %v148_v45 }
 0x10b   :  { %v153_v50 = vpack.c.bf16 %v151_v48, %v149_v47 }
 0x10d   :  { %321 = vmatprep.mubr.bf16.mxu1 %v153_v50 }
 0x10e   :  { %322 = vmatmul.mubr.bf16.vlgmr.msra.gmra.mrb[0].mxu1 %v152_v49 }
 0x10f   :  { %697 = vmatprep.mubr.msk.bf16.mxu1 %vm829_vm1, %v828_v25  ;;  %682 = vmatpush3.bf16.msra.mxu1 %v741_v54 }
 0x110   :  { %683 = vmatprep.subr.bf16.mxu1 %v828_v25 }
 0x113   :  { %684 = vmatpush3.bf16.msra.mxu1 %v742_v55 }
 0x114   :  { %685 = vmatprep.subr.bf16.mxu1 %v828_v25 }
 0x117   :  { %686 = vmatpush3.bf16.msra.mxu1 %v743_v56 }
 0x118   :  { %687 = vmatprep.subr.bf16.mxu1 %v828_v25 }
 0x11b   :  { %688 = vmatpush3.bf16.msra.mxu1 %v744_v57 }
 0x11c   :  { %689 = vmatprep.subr.bf16.mxu1 %v828_v25 }
 0x11f   :  { %690 = vmatpush3.bf16.msra.mxu1 %v745_v58 }
 0x120   :  { %691 = vmatprep.subr.bf16.mxu1 %v828_v25 }
 0x123   :  { %692 = vmatpush3.bf16.msra.mxu1 %v746_v59 }
 0x124   :  { %693 = vmatprep.subr.bf16.mxu1 %v828_v25 }
 0x127   :  { %694 = vmatpush3.bf16.msra.mxu1 %v747_v8 }
 0x128   :  { %695 = vmatprep.subr.bf16.mxu1 %v828_v25 }
 0x12b   :  { %696 = vmatpush3.bf16.msra.mxu1 %v748_v9 }
 0x1e1   :  { %v637_v60 = vpop.f32.mrb[0].mxu1 }
 0x1e2   :  { %v638_v62 = vpop.f32.mrb[1].mxu1 }
 0x1e3   :  { %v639_v63 = vadd.f32 %v638_v62, %v637_v60  ;;  %v640_v0 = vpop.f32.mrb[2].mxu1 }
 0x1e4   :  { %v641_v1 = vpop.f32.mrb[3].mxu1 }
 0x1e5   :  { %v324_v2 = vadd.f32 %v639_v63, %v586_v61  ;;  %v642_v3 = vadd.f32 %v641_v1, %v640_v0 }
 0x1e7   :  { %v327_v4 = vadd.f32 %v642_v3, %v586_v61  ;;  %v330_v5 = vmax.f32 %v324_v2, 0.0 }
 0x1e9   :  { %v331_v6 = vmax.f32 %v327_v4, 0.0 }
 0x1eb   :  { %v332_v7 = vpack.c.bf16 %v331_v6, %v330_v5 }
 0x1ed   :  { %678 = vmatmul.mubr.bf16.vlgmr.msra.gmra.mrb[4].mxu0 %v332_v7 }
 0x2c0   :  { %v438_v11 = vpop.f32.mrb[4].mxu0 }
 0x2c1   :  { %v439_v12 = vadd.f32 %v603_v10, %v438_v11  ;;  %v679_v13 = vpop.f32.mrb[5].mxu0 }
 0x2c2   :  { %v441_v14 = vpop.f32.mrb[6].mxu0 }
 0x2c3   :  { %v442_v15 = vadd.f32 %v603_v10, %v441_v14  ;;  %v680_v16 = vpop.f32.mrb[7].mxu0  ;;  %v445_v17 = vmax.f32 %v439_v12, 0.0 }
 0x2c5   :  { %v446_v18 = vmax.f32 %v442_v15, 0.0 }
 0x2c7   :  { %v447_v19 = vpack.c.bf16 %v446_v18, %v445_v17 }
 0x2c9   :  { %698 = vmatmul.mubr.bf16.vlgmr.msra.gmra.mrb[4].mxu1 %v447_v19 }
 0x39c   :  { %v553_v21 = vpop.f32.mrb[4].mxu1 }
 0x39d   :  { %v554_v22 = vadd.f32 %v612_v20, %v553_v21  ;;  %v699_v23 = vpop.f32.mrb[5].mxu1 }
 0x39e   :  { %v556_v24 = vpop.f32.mrb[6].mxu1 }
 0x39f   :  { %v557_v25 = vadd.f32 %v612_v20, %v556_v24  ;;  %v700_v26 = vpop.f32.mrb[7].mxu1  ;;  %561 = vst.msk [vmem:[#allocation7] sm:$0xff] %vm560_vm2, %v554_v22 }
 0x3a1   :  { %562 = vst.msk [vmem:[#allocation7 + $0x8] sm:$0xff] %vm560_vm2, %v557_v25 }
 0x3a2   :  { %804 = shalt.err (!%p801_p6)
}
 0x3a3   :  { %s805_s13 = scalar_lea.hbm %s1016_s9, 256 }
 0x3a4   :  { %p806_p7 = scmp.ne.s32.totalorder %s1016_s9, %s805_s13  ;;  %p809_p8 = scmp.lt.u32.totalorder %s805_s13, %s1016_s9 }
 0x3a6   :  { %p811_p9 = pnand %p809_p8, %p806_p7 }
 0x3a8   :  { %814 = shalt.err (!%p811_p9)
}
 0x3a9   :  { %574 = dma.vmem_to_hbm [thread:$0]  %s569_s1, 256, %s1016_s9, [#allocation4], %s822_s19, %s822_s19, %s823_s20  }
 0x3aa   :  { %819 = dma.done.wait [#allocation4], 256  }
 0x3ab   :  { %820 = vsyncadd [#allocation4], 4294967040 }
 0x3ac   :  { %578 = vsyncpa [#allocation3], 1 }
 0x3ad   :  { %579 = vsyncpa [#allocation6], 1 }
 0x3ae   :  { %580 = vsyncpa [#allocation4], 1 }

// kernel: tpu_custom_call.1
= control target key start
LH: loop header
LB: loop body
LE: loop exit
PB: predicated region body
PF: predicated region fallthrough
CT: control target
= control target key end

     0   :  { %14 = vsyncpa [#allocation3], 0  ;;  %s1007_s0 = inlined_call_operand.vmem [shape: f32[16,32], index: 0, kind: input, shape index: {}]   ;;  %s1008_s1 = inlined_call_operand.hbm [shape: bf16[32,256], index: 1, kind: input, shape index: {}]   ;;  %s1009_s2 = inlined_call_operand.vmem [shape: f32[1,256], index: 2, kind: input, shape index: {}]   ;;  %s1010_s3 = inlined_call_operand.hbm [shape: bf16[256,128], index: 3, kind: input, shape index: {}]   ;;  %s1011_s4 = inlined_call_operand.vmem [shape: f32[1,128], index: 4, kind: input, shape index: {}]   ;;  %s1012_s5 = inlined_call_operand.vmem [shape: bf16[128,128], index: 5, kind: input, shape index: {}]   ;;  %s1013_s6 = inlined_call_operand.vmem [shape: f32[1,128], index: 6, kind: input, shape index: {}]   ;;  %s1014_s7 = inlined_call_operand.vmem [shape: bf16[128,16], index: 7, kind: input, shape index: {}]   ;;  %s1015_s8 = inlined_call_operand.vmem [shape: f32[1,16], index: 8, kind: input, shape index: {}]   ;;  %s1016_s9 = inlined_call_operand.hbm [shape: f32[16,16], index: 9, kind: output, shape index: {}]  }
   0x1   :  { %15 = vsyncpa [#allocation6], 0 }
   0x2   :  { %16 = vsyncpa [#allocation4], 0  ;;  %s821_s30 = smov [#allocation2]   ;;  %s749_s13 = scalar_lea.hbm %s1008_s1, 512 }
   0x3   :  { %s24_s10 = sshll.u32 %s821_s30, 4  ;;  %p750_p0 = scmp.ne.s32.totalorder %s1008_s1, %s749_s13  ;;  %s25_s10 = int_to_ptr.vmem [resolvable:$true] %s24_s10 }
   0x4   :  { %p753_p1 = scmp.lt.u32.totalorder %s749_s13, %s1008_s1 }
   0x6   :  { %p755_p2 = pnand %p753_p1, %p750_p0 }
   0x8   :  { %758 = shalt.err (!%p755_p2)
}
   0x9   :  { %s759_s18 = scalar_lea.vmem %s25_s10, 512  ;;  %p764_p4 = scmp.lt.s32.totalorder %s25_s10, %s25_s10 }
   0xa   :  { %p760_p3 = scmp.ne.s32.totalorder %s25_s10, %s759_s18  ;;  %p765_p5 = scmp.lt.s32.totalorder %s759_s18, %s759_s18 }
   0xc   :  { %p766_p6 = por %p765_p5, %p764_p4 }
   0xe   :  { %p767_p7 = pnand %p766_p6, %p760_p3 }
  0x10   :  { %770 = shalt.err (!%p767_p7)
}
  0x11   :  { %s822_s19 = smov 128   ;;  %s823_s20 = smov 8  }
  0x12   :  { %30 = dma.hbm_to_vmem [thread:$0]  %s1008_s1, 512, %s25_s10, [#allocation3], %s822_s19, %s822_s19, %s823_s20  }
  0x13   :  { %s824_s23 = smov [#allocation5]   ;;  %s771_s27 = scalar_lea.hbm %s1010_s3, 2048 }
  0x14   :  { %s38_s24 = sshll.u32 %s824_s23, 4  ;;  %p772_p8 = scmp.ne.s32.totalorder %s1010_s3, %s771_s27  ;;  %s39_s24 = int_to_ptr.vmem [resolvable:$true] %s38_s24 }
  0x15   :  { %p775_p9 = scmp.lt.u32.totalorder %s771_s27, %s1010_s3 }
  0x17   :  { %p777_p10 = pnand %p775_p9, %p772_p8 }
  0x19   :  { %780 = shalt.err (!%p777_p10)
}
  0x1a   :  { %s781_s12 = scalar_lea.vmem %s39_s24, 2048  ;;  %p786_p12 = scmp.lt.s32.totalorder %s39_s24, %s39_s24 }
  0x1b   :  { %p782_p11 = scmp.ne.s32.totalorder %s39_s24, %s781_s12  ;;  %p787_p13 = scmp.lt.s32.totalorder %s781_s12, %s781_s12 }
  0x1d   :  { %p788_p0 = por %p787_p13, %p786_p12 }
  0x1f   :  { %p789_p1 = pnand %p788_p0, %p782_p11 }
  0x21   :  { %792 = shalt.err (!%p789_p1)
}
  0x22   :  { %s825_s1 = smov 64   ;;  %s826_s10 = smov 4  }
  0x23   :  { %44 = dma.hbm_to_vmem [thread:$0]  %s1010_s3, 2048, %s39_s24, [#allocation6], %s825_s1, %s825_s1, %s826_s10  }
  0x24   :  { %815 = dma.done.wait [#allocation3], 512  }
  0x25   :  { %816 = vsyncadd [#allocation3], 4294966784 }
  0x26   :  { %817 = dma.done.wait [#allocation6], 2048  }
  0x27   :  { %818 = vsyncadd [#allocation6], 4294965248  ;;  %v827_v0 = vmov 0   ;;  %v711_v1 = vld [vmem:[#allocation2 + $0x4] ss:$8 sps:$4 sm:$0xff]   ;;  %vm101_vm0 = vcmask 261120   ;;  %v71_v30 = vlaneseq }
  0x28   :  { %137 = vmatprep.mubr.bf16.mxu0 %v827_v0  ;;  %v713_v2 = vld [vmem:[#allocation2] ss:$8 sps:$4 sm:$0xff]   ;;  %105 = vmatprep.subr.bf16.mxu0 %v711_v1  ;;  %v714_v3 = vld [vmem:[#allocation2 + $0x14] ss:$8 sps:$4 sm:$0xff]   ;;  %v716_v4 = vld [vmem:[#allocation2 + $0x10] ss:$8 sps:$4 sm:$0xff]  }
  0x29   :  { %v62_v5 = vld [vmem:[%s1007_s0] sm:$0xff]  ;;  %106 = vmatpush1.bf16.msra.mxu0 %v713_v2  ;;  %v63_v6 = vld [vmem:[%s1007_s0 + $0x8] sm:$0xff]  ;;  %v721_v12 = vld [vmem:[#allocation5 + $0x50] sm:$0xff]   ;;  %v828_v25 = vmov 0.0   ;;  %v72_v31 = vshrl.u32 %v71_v30, 7  ;;  %vm829_vm1 = vmmov 0  }
  0x2a   :  { %107 = vmatprep.subr.bf16.mxu0 %v714_v3  ;;  %v717_v7 = vld [vmem:[#allocation5 + $0x40] sm:$0xff]   ;;  %v64_v9 = vpack.c.bf16 %v63_v6, %v62_v5  ;;  %v719_v10 = vld [vmem:[#allocation5 + $0x48] sm:$0xff]   ;;  %v722_v13 = vld [vmem:[#allocation5 + $0x10] sm:$0xff]   ;;  %vm560_vm2 = vcmask 130048  }
  0x2b   :  { %v718_v8 = vld [vmem:[#allocation5] sm:$0xff]   ;;  %621 = vmatprep.subr.bf16.mxu1 %v717_v7  ;;  %v720_v11 = vld [vmem:[#allocation5 + $0x8] sm:$0xff]   ;;  %v723_v14 = vld [vmem:[#allocation5 + $0x58] sm:$0xff]   ;;  %v73_v32 = vsub.s32 0, %v72_v31  ;;  %v77_v34 = vsub.s32 1, %v72_v31 }
  0x2c   :  { %622 = vmatpush3.bf16.msra.mxu1 %v718_v8  ;;  %v724_v15 = vld [vmem:[#allocation5 + $0x18] sm:$0xff]   ;;  %v725_v16 = vld [vmem:[#allocation5 + $0x60] sm:$0xff]   ;;  %v727_v18 = vld [vmem:[#allocation5 + $0x68] sm:$0xff]  }
  0x2d   :  { %108 = vmatpush1.bf16.msra.mxu0 %v716_v4  ;;  %623 = vmatprep.subr.bf16.mxu1 %v719_v10  ;;  %v726_v17 = vld [vmem:[#allocation5 + $0x20] sm:$0xff]   ;;  %v728_v19 = vld [vmem:[#allocation5 + $0x28] sm:$0xff]   ;;  %v729_v20 = vld [vmem:[#allocation5 + $0x70] sm:$0xff]  }
  0x2e   :  { %v730_v21 = vld [vmem:[#allocation5 + $0x30] sm:$0xff]   ;;  %v731_v22 = vld [vmem:[#allocation5 + $0x78] sm:$0xff]   ;;  %v733_v24 = vld [vmem:[%s1012_s5] sm:$0xff]   ;;  %661 = vmatprep.subr.bf16.mxu0 %v828_v25 }
  0x2f   :  { %v732_v23 = vld [vmem:[#allocation5 + $0x38] sm:$0xff]   ;;  %v734_v26 = vld [vmem:[%s1012_s5 + $0x8] sm:$0xff]   ;;  %v735_v27 = vld [vmem:[%s1012_s5 + $0x10] sm:$0xff]  }
  0x30   :  { %585 = vmatmul.mubr.msk.bf16.vlgmr.msra.gmra.mrb[0].mxu0 %vm101_vm0, %v64_v9  ;;  %624 = vmatpush3.bf16.msra.mxu1 %v720_v11  ;;  %v736_v28 = vld [vmem:[%s1012_s5 + $0x18] sm:$0xff]   ;;  %v737_v29 = vld [vmem:[%s1012_s5 + $0x20] sm:$0xff]   ;;  %v738_v51 = vld [vmem:[%s1012_s5 + $0x28] sm:$0xff]  }
  0x31   :  { %625 = vmatprep.subr.bf16.mxu1 %v721_v12  ;;  %662 = vmatpush3.bf16.msra.mxu0 %v733_v24  ;;  %v69_v33 = vld [vmem:[%s1009_s2] sm:$0x3]  ;;  %v739_v52 = vld [vmem:[%s1012_s5 + $0x30] sm:$0xff]   ;;  %v740_v53 = vld [vmem:[%s1012_s5 + $0x38] sm:$0xff]  }
  0x32   :  { %663 = vmatprep.subr.bf16.mxu0 %v828_v25  ;;  %v74_v35 = vrot.slane %v69_v33, %v73_v32  ;;  %v78_v36 = vrot.slane %v69_v33, %v77_v34  ;;  %677 = vmatprep.mubr.msk.bf16.mxu0 %vm829_vm1, %v828_v25  ;;  %v741_v54 = vld [vmem:[%s1014_s7] sm:$0xff]   ;;  %v742_v55 = vld [vmem:[%s1014_s7 + $0x8] sm:$0xff]   ;;  %v743_v56 = vld [vmem:[%s1014_s7 + $0x10] sm:$0xff]  }
  0x33   :  { %v744_v57 = vld [vmem:[%s1014_s7 + $0x18] sm:$0xff]   ;;  %v745_v58 = vld [vmem:[%s1014_s7 + $0x20] sm:$0xff]   ;;  %v746_v59 = vld [vmem:[%s1014_s7 + $0x28] sm:$0xff]  }
  0x34   :  { %626 = vmatpush3.bf16.msra.mxu1 %v722_v13  ;;  %v586_v61 = vld [vmem:[%s1011_s4] ss:$0 sm:$0xff]  ;;  %v747_v8 = vld [vmem:[%s1014_s7 + $0x30] sm:$0xff]   ;;  %v748_v9 = vld [vmem:[%s1014_s7 + $0x38] sm:$0xff]   ;;  %s830_s7 = smov [#allocation7]  }
  0x35   :  { %627 = vmatprep.subr.bf16.mxu1 %v723_v14  ;;  %664 = vmatpush3.bf16.msra.mxu0 %v734_v26  ;;  %v603_v10 = vld [vmem:[%s1013_s6] ss:$0 sm:$0xff]  ;;  %s568_s1 = sshll.u32 %s830_s7, 4  ;;  %s569_s1 = int_to_ptr.vmem [resolvable:$true] %s568_s1 }
  0x36   :  { %665 = vmatprep.subr.bf16.mxu0 %v828_v25  ;;  %s793_s6 = scalar_lea.vmem %s569_s1, 256  ;;  %p798_p3 = scmp.lt.s32.totalorder %s569_s1, %s569_s1 }
  0x37   :  { %p794_p2 = scmp.ne.s32.totalorder %s569_s1, %s793_s6  ;;  %p799_p4 = scmp.lt.s32.totalorder %s793_s6, %s793_s6 }
  0x38   :  { %628 = vmatpush3.bf16.msra.mxu1 %v724_v15 }
  0x39   :  { %629 = vmatprep.subr.bf16.mxu1 %v725_v16  ;;  %666 = vmatpush3.bf16.msra.mxu0 %v735_v27  ;;  %p800_p5 = por %p799_p4, %p798_p3 }
  0x3a   :  { %667 = vmatprep.subr.bf16.mxu0 %v828_v25 }
  0x3b   :  { %p801_p6 = pnand %p800_p5, %p794_p2 }
  0x3c   :  { %630 = vmatpush3.bf16.msra.mxu1 %v726_v17 }
  0x3d   :  { %631 = vmatprep.subr.bf16.mxu1 %v727_v18  ;;  %668 = vmatpush3.bf16.msra.mxu0 %v736_v28 }
  0x3e   :  { %669 = vmatprep.subr.bf16.mxu0 %v828_v25 }
  0x40   :  { %632 = vmatpush3.bf16.msra.mxu1 %v728_v19 }
  0x41   :  { %633 = vmatprep.subr.bf16.mxu1 %v729_v20  ;;  %670 = vmatpush3.bf16.msra.mxu0 %v737_v29  ;;  %v612_v20 = vld [vmem:[%s1015_s8] ss:$0 sm:$0xff] }
  0x42   :  { %671 = vmatprep.subr.bf16.mxu0 %v828_v25 }
  0x44   :  { %634 = vmatpush3.bf16.msra.mxu1 %v730_v21 }
  0x45   :  { %635 = vmatprep.subr.bf16.mxu1 %v731_v22  ;;  %672 = vmatpush3.bf16.msra.mxu0 %v738_v51 }
  0x46   :  { %673 = vmatprep.subr.bf16.mxu0 %v828_v25 }
  0x48   :  { %636 = vmatpush3.bf16.msra.mxu1 %v732_v23 }
  0x49   :  { %681 = vmatprep.subr.bf16.mxu1 %v828_v25  ;;  %674 = vmatpush3.bf16.msra.mxu0 %v739_v52 }
  0x4a   :  { %675 = vmatprep.subr.bf16.mxu0 %v828_v25 }
  0x4d   :  { %676 = vmatpush3.bf16.msra.mxu0 %v740_v53 }
 0x103   :  { %v139_v37 = vpop.f32.mrb[0].mxu0 }
 0x104   :  { %v140_v38 = vadd.f32 %v139_v37, %v74_v35  ;;  %v141_v39 = vpop.f32.mrb[1].mxu0 }
 0x105   :  { %v142_v40 = vadd.f32 %v141_v39, %v78_v36  ;;  %v143_v41 = vpop.f32.mrb[2].mxu0 }
 0x106   :  { %v144_v42 = vadd.f32 %v143_v41, %v74_v35  ;;  %v145_v43 = vpop.f32.mrb[3].mxu0  ;;  %v148_v45 = vmax.f32 %v140_v38, 0.0 }
 0x107   :  { %v146_v44 = vadd.f32 %v145_v43, %v78_v36  ;;  %v149_v47 = vmax.f32 %v142_v40, 0.0 }
 0x108   :  { %v150_v46 = vmax.f32 %v144_v42, 0.0 }
 0x109   :  { %v151_v48 = vmax.f32 %v146_v44, 0.0 }
 0x10a   :  { %v152_v49 = vpack.c.bf16 %v150_v46, %v148_v45 }
 0x10b   :  { %v153_v50 = vpack.c.bf16 %v151_v48, %v149_v47 }
 0x10d   :  { %321 = vmatprep.mubr.bf16.mxu1 %v153_v50 }
 0x10e   :  { %322 = vmatmul.mubr.bf16.vlgmr.msra.gmra.mrb[0].mxu1 %v152_v49 }
 0x10f   :  { %697 = vmatprep.mubr.msk.bf16.mxu1 %vm829_vm1, %v828_v25  ;;  %682 = vmatpush3.bf16.msra.mxu1 %v741_v54 }
 0x110   :  { %683 = vmatprep.subr.bf16.mxu1 %v828_v25 }
 0x113   :  { %684 = vmatpush3.bf16.msra.mxu1 %v742_v55 }
 0x114   :  { %685 = vmatprep.subr.bf16.mxu1 %v828_v25 }
 0x117   :  { %686 = vmatpush3.bf16.msra.mxu1 %v743_v56 }
 0x118   :  { %687 = vmatprep.subr.bf16.mxu1 %v828_v25 }
 0x11b   :  { %688 = vmatpush3.bf16.msra.mxu1 %v744_v57 }
 0x11c   :  { %689 = vmatprep.subr.bf16.mxu1 %v828_v25 }
 0x11f   :  { %690 = vmatpush3.bf16.msra.mxu1 %v745_v58 }
 0x120   :  { %691 = vmatprep.subr.bf16.mxu1 %v828_v25 }
 0x123   :  { %692 = vmatpush3.bf16.msra.mxu1 %v746_v59 }
 0x124   :  { %693 = vmatprep.subr.bf16.mxu1 %v828_v25 }
 0x127   :  { %694 = vmatpush3.bf16.msra.mxu1 %v747_v8 }
 0x128   :  { %695 = vmatprep.subr.bf16.mxu1 %v828_v25 }
 0x12b   :  { %696 = vmatpush3.bf16.msra.mxu1 %v748_v9 }
 0x1e1   :  { %v637_v60 = vpop.f32.mrb[0].mxu1 }
 0x1e2   :  { %v638_v62 = vpop.f32.mrb[1].mxu1 }
 0x1e3   :  { %v639_v63 = vadd.f32 %v638_v62, %v637_v60  ;;  %v640_v0 = vpop.f32.mrb[2].mxu1 }
 0x1e4   :  { %v641_v1 = vpop.f32.mrb[3].mxu1 }
 0x1e5   :  { %v324_v2 = vadd.f32 %v639_v63, %v586_v61  ;;  %v642_v3 = vadd.f32 %v641_v1, %v640_v0 }
 0x1e7   :  { %v327_v4 = vadd.f32 %v642_v3, %v586_v61  ;;  %v330_v5 = vmax.f32 %v324_v2, 0.0 }
 0x1e9   :  { %v331_v6 = vmax.f32 %v327_v4, 0.0 }
 0x1eb   :  { %v332_v7 = vpack.c.bf16 %v331_v6, %v330_v5 }
 0x1ed   :  { %678 = vmatmul.mubr.bf16.vlgmr.msra.gmra.mrb[4].mxu0 %v332_v7 }
 0x2c0   :  { %v438_v11 = vpop.f32.mrb[4].mxu0 }
 0x2c1   :  { %v439_v12 = vadd.f32 %v603_v10, %v438_v11  ;;  %v679_v13 = vpop.f32.mrb[5].mxu0 }
 0x2c2   :  { %v441_v14 = vpop.f32.mrb[6].mxu0 }
 0x2c3   :  { %v442_v15 = vadd.f32 %v603_v10, %v441_v14  ;;  %v680_v16 = vpop.f32.mrb[7].mxu0  ;;  %v445_v17 = vmax.f32 %v439_v12, 0.0 }
 0x2c5   :  { %v446_v18 = vmax.f32 %v442_v15, 0.0 }
 0x2c7   :  { %v447_v19 = vpack.c.bf16 %v446_v18, %v445_v17 }
 0x2c9   :  { %698 = vmatmul.mubr.bf16.vlgmr.msra.gmra.mrb[4].mxu1 %v447_v19 }
 0x39c   :  { %v553_v21 = vpop.f32.mrb[4].mxu1 }
 0x39d   :  { %v554_v22 = vadd.f32 %v612_v20, %v553_v21  ;;  %v699_v23 = vpop.f32.mrb[5].mxu1 }
 0x39e   :  { %v556_v24 = vpop.f32.mrb[6].mxu1 }
 0x39f   :  { %v557_v25 = vadd.f32 %v612_v20, %v556_v24  ;;  %v700_v26 = vpop.f32.mrb[7].mxu1  ;;  %561 = vst.msk [vmem:[#allocation7] sm:$0xff] %vm560_vm2, %v554_v22 }
 0x3a1   :  { %562 = vst.msk [vmem:[#allocation7 + $0x8] sm:$0xff] %vm560_vm2, %v557_v25 }
 0x3a2   :  { %804 = shalt.err (!%p801_p6)
}
 0x3a3   :  { %s805_s13 = scalar_lea.hbm %s1016_s9, 256 }
 0x3a4   :  { %p806_p7 = scmp.ne.s32.totalorder %s1016_s9, %s805_s13  ;;  %p809_p8 = scmp.lt.u32.totalorder %s805_s13, %s1016_s9 }
 0x3a6   :  { %p811_p9 = pnand %p809_p8, %p806_p7 }
 0x3a8   :  { %814 = shalt.err (!%p811_p9)
}
 0x3a9   :  { %574 = dma.vmem_to_hbm [thread:$0]  %s569_s1, 256, %s1016_s9, [#allocation4], %s822_s19, %s822_s19, %s823_s20  }
 0x3aa   :  { %819 = dma.done.wait [#allocation4], 256  }
 0x3ab   :  { %820 = vsyncadd [#allocation4], 4294967040 }
 0x3ac   :  { %578 = vsyncpa [#allocation3], 1 }
 0x3ad   :  { %579 = vsyncpa [#allocation6], 1 }
 0x3ae   :  { %580 = vsyncpa [#allocation4], 1 }

</bundles_post_ra>
